<compile_context>
chip_gen: v5e
topology: v5e:2x2
jax: 0.10.0
libtpu: 0.0.40
codegen_flags: <defaults>
</compile_context>

<pallas_src>
import functools
import math

import jax
import jax.numpy as jnp
from jax import lax
from jax.experimental import pallas as pl
from jax.experimental.pallas import tpu as pltpu


def _classifier_kernel(st, ed, n_hidden, apply_sigmoid, negative_slope, *refs):
    width = ed - st
    n_layers = n_hidden + 1
    x_ref = refs[0]
    wb = refs[1:1 + 2 * n_layers]
    out_ref = refs[1 + 2 * n_layers]
    label_ref = refs[2 + 2 * n_layers] if width >= 2 else None

    x = x_ref[...].astype(jnp.float32)           # (TILE_B, D_in) f32
    xt = jnp.transpose(x)                        # (D_in, TILE_B): single transpose per tile;
                                                 # everything below is feature-major.

    ridx = lax.broadcasted_iota(jnp.int32, xt.shape, 0)      # feature index per sublane row
    in_rng = (ridx >= st) & (ridx < ed)

    # ---- label = argmax over features [st, ed) (first max wins, like torch.argmax) ----
    if width >= 2:
        s = jnp.where(in_rng, xt, jnp.float32(-jnp.inf))     # (D_in, TILE_B)
        m = jnp.max(s, axis=0, keepdims=True)                # (1, TILE_B) sublane reduce
        big = jnp.iinfo(jnp.int32).max
        lab = jnp.min(jnp.where(in_rng & (s == m), ridx - st, big),
                      axis=0, keepdims=True)                 # (1, TILE_B) int32
        label_ref[...] = lab

    # ---- MLP; torch.cat column drop == zero the removed rows (W1 has padded rows there) ----
    h = jnp.where(in_rng, jnp.float32(0.0), xt)              # (D_in, TILE_B)
    for li in range(n_hidden):
        wt = wb[2 * li][...]                                 # (H_out, H_in) f32, VMEM-resident
        b = wb[2 * li + 1][...]                              # (H_out, 1) f32
        h = jnp.dot(wt, h, preferred_element_type=jnp.float32) + b
        h = jnp.where(h > 0, h, negative_slope * h)          # LeakyReLU(0.2)
        # Dropout(0.5): identity in eval mode.

    wt_out = wb[2 * n_hidden][...]                           # (out_dim, H_last)
    b_out = wb[2 * n_hidden + 1][...]                        # (out_dim, 1)
    o = jnp.dot(wt_out, h, preferred_element_type=jnp.float32) + b_out   # (out_dim, TILE_B)
    if apply_sigmoid:
        o = jax.nn.sigmoid(o)
    out_ref[...] = o.astype(out_ref.dtype)                   # lane-dense store


def classifier_forward(x, params, st_ed, *, tile_b=1024):
    """Fused Classifier forward. Returns (output, label) like the torch module (eval mode)."""
    st, ed = st_ed
    width = ed - st
    B, d_in = x.shape
    n_layers = len(params) // 2
    n_hidden = n_layers - 1
    weights = [params[2 * i] for i in range(n_layers)]       # (fan_in, fan_out)
    biases = [params[2 * i + 1] for i in range(n_layers)]
    out_dim = weights[-1].shape[1]

    # Fold cat(x[:, :st], x[:, ed:]) into layer 1 by inserting zero rows for [st, ed), then
    # transpose every weight (feature-major: h_t = W^T @ x_t). All tiny, done once.
    h1 = weights[0].shape[1]
    w1_full = jnp.concatenate(
        [weights[0][:st], jnp.zeros((width, h1), weights[0].dtype), weights[0][st:]], axis=0)
    wts = [jnp.transpose(w1_full).astype(jnp.float32)] + \
          [jnp.transpose(w).astype(jnp.float32) for w in weights[1:]]
    bcols = [jnp.reshape(b, (-1, 1)).astype(jnp.float32) for b in biases]

    # Batch tiling. No wrapper-side pad/cast/transpose of x; ragged tails use partial blocks.
    tile_b = int(tile_b)
    if B <= tile_b:
        tile_b = B                                   # single block == full array dims
    else:
        tile_b = max(128, (tile_b // 128) * 128)     # lane-dense output blocks need 128-multiples
    grid = pl.cdiv(B, tile_b)

    in_specs = [pl.BlockSpec((tile_b, d_in), lambda i: (i, 0))]
    args = [x]
    for wt, b in zip(wts, bcols):
        in_specs.append(pl.BlockSpec(wt.shape, lambda i: (0, 0)))   # weights stay VMEM-resident
        in_specs.append(pl.BlockSpec(b.shape, lambda i: (0, 0)))
        args += [wt, b]

    out_shapes = [jax.ShapeDtypeStruct((out_dim, B), jnp.float32)]
    out_specs = [pl.BlockSpec((out_dim, tile_b), lambda i: (0, i))]
    if width >= 2:
        out_shapes.append(jax.ShapeDtypeStruct((1, B), jnp.int32))
        out_specs.append(pl.BlockSpec((1, tile_b), lambda i: (0, i)))

    kernel = functools.partial(_classifier_kernel, st, ed, n_hidden, width == 2, 0.2)

    results = pl.pallas_call(
        kernel,
        grid=(grid,),
        in_specs=in_specs,
        out_specs=tuple(out_specs),
        out_shape=tuple(out_shapes),
        compiler_params=pltpu.CompilerParams(dimension_semantics=("parallel",)),
    )(*args)

    if width >= 2:
        out_t, label_raw = results
        label = label_raw.reshape(-1)                # (B,) int32 (torch gives int64)
    else:
        (out_t,) = results
        label = x[:, st:ed]                          # torch returns the raw slice when width == 1

    if width in (1, 2):
        out = out_t.reshape(-1)                      # out_dim == 1 here; matches .view(-1)
    else:
        out = jnp.transpose(out_t)                   # (B, out_dim)
    return out, label


def _reference_forward(x, params, st_ed):
    """Pure-JAX f32 reference mirroring torch semantics (eval mode)."""
    st, ed = st_ed
    width = ed - st
    n_layers = len(params) // 2
    if width == 1:
        label = x[:, st:ed]
    else:
        label = jnp.argmax(x[:, st:ed], axis=-1).astype(jnp.int32)
    h = jnp.concatenate([x[:, :st], x[:, ed:]], axis=1)
    for li in range(n_layers - 1):
        h = h @ params[2 * li] + params[2 * li + 1].reshape(1, -1)
        h = jnp.where(h > 0, h, 0.2 * h)
    o = h @ params[-2] + params[-1].reshape(1, -1)
    if width == 2:
        o = jax.nn.sigmoid(o)
    if width in (1, 2):
        return o.reshape(-1), label
    return o, label


def _init_linear(key, fan_in, fan_out):
    """Deterministic init matching torch.nn.Linear's uniform(-1/sqrt(fan_in), ...) scale."""
    kw, kb = jax.random.split(key)
    bound = 1.0 / math.sqrt(fan_in)
    w = jax.random.uniform(kw, (fan_in, fan_out), jnp.float32, -bound, bound)
    b = jax.random.uniform(kb, (fan_out,), jnp.float32, -bound, bound)
    return w, b


def _make_params(key, input_dim, dis_dims, st_ed):
    width = st_ed[1] - st_ed[0]
    dim = input_dim - width
    out_dim = 1 if width in (1, 2) else width
    dims = [dim] + list(dis_dims) + [out_dim]
    params = []
    for i in range(len(dims) - 1):
        key, sub = jax.random.split(key)
        w, b = _init_linear(sub, dims[i], dims[i + 1])
        params += [w, b]
    return tuple(params)


if __name__ == "__main__":
    key = jax.random.PRNGKey(0)

    # ---- Case 1: width == 2 (Linear->1 + Sigmoid, view(-1)); B=512, tile_b=256 -> 2-step grid
    k1, k2, key = jax.random.split(key, 3)
    B1, input_dim, st_ed1, dis_dims = 512, 32, (4, 6), (32, 16)
    x1 = jax.random.normal(k1, (B1, input_dim), dtype=jnp.float32)
    params1 = _make_params(k2, input_dim, dis_dims, st_ed1)
    out1, lab1 = classifier_forward(x1, params1, st_ed1, tile_b=256)
    jax.block_until_ready((out1, lab1))
    ref_o1, ref_l1 = _reference_forward(x1, params1, st_ed1)
    assert out1.shape == (B1,) and out1.dtype == jnp.float32
    assert lab1.shape == (B1,) and lab1.dtype == jnp.int32
    assert bool(jnp.array_equal(lab1, ref_l1))
    assert bool(jnp.allclose(out1, ref_o1, rtol=2e-2, atol=2e-2))

    # ---- Case 2: width > 2 (Linear->width), ragged batch: B=300, tile_b=128 -> partial tail block
    k3, k4, key = jax.random.split(key, 3)
    B2, st_ed2 = 300, (4, 9)
    x2 = jax.random.normal(k3, (B2, input_dim), dtype=jnp.float32)
    params2 = _make_params(k4, input_dim, dis_dims, st_ed2)
    out2, lab2 = classifier_forward(x2, params2, st_ed2, tile_b=128)
    jax.block_until_ready((out2, lab2))
    ref_o2, ref_l2 = _reference_forward(x2, params2, st_ed2)
    assert out2.shape == (B2, 5) and lab2.shape == (B2,)
    assert bool(jnp.array_equal(lab2, ref_l2))
    assert bool(jnp.allclose(out2, ref_o2, rtol=2e-2, atol=2e-2))

    # ---- Case 3: width == 1 (raw-slice label, Linear->1, no sigmoid); single full-batch block
    k5, k6, key = jax.random.split(key, 3)
    B3, st_ed3 = 512, (7, 8)
    x3 = jax.random.normal(k5, (B3, input_dim), dtype=jnp.float32)
    params3 = _make_params(k6, input_dim, dis_dims, st_ed3)
    out3, lab3 = classifier_forward(x3, params3, st_ed3)
    jax.block_until_ready((out3, lab3))
    ref_o3, ref_l3 = _reference_forward(x3, params3, st_ed3)
    assert out3.shape == (B3,) and lab3.shape == (B3, 1)
    assert bool(jnp.array_equal(lab3, ref_l3))
    assert bool(jnp.allclose(out3, ref_o3, rtol=2e-2, atol=2e-2))

    print("KERNEL_OK")
</pallas_src>

<mosaic_0001>
module attributes {stable_mosaic.version = 11 : i64} {
  func.func @_classifier_kernel(%arg0: i32, %arg1: memref<256x32xf32, #tpu.memory_space<vmem>>, %arg2: memref<32x32xf32, #tpu.memory_space<vmem>>, %arg3: memref<32x1xf32, #tpu.memory_space<vmem>>, %arg4: memref<16x32xf32, #tpu.memory_space<vmem>>, %arg5: memref<16x1xf32, #tpu.memory_space<vmem>>, %arg6: memref<1x16xf32, #tpu.memory_space<vmem>>, %arg7: memref<1x1xf32, #tpu.memory_space<vmem>>, %arg8: memref<1x256xf32, #tpu.memory_space<vmem>>, %arg9: memref<1x256xi32, #tpu.memory_space<vmem>>) attributes {dimension_semantics = [#tpu.dimension_semantics<parallel>], iteration_bounds = array<i64: 2>, scalar_prefetch = 0 : i64, scratch_operands = 0 : i64, tpu.core_type = #tpu.core_type<tc>, window_params = [{transform_indices = @transform_0, window_bounds = array<i64: 256, 32>}, {pipeline_mode = #tpu.pipeline_mode<synchronous>, transform_indices = @transform_1, window_bounds = array<i64: 32, 32>}, {pipeline_mode = #tpu.pipeline_mode<synchronous>, transform_indices = @transform_2, window_bounds = array<i64: 32, 1>}, {pipeline_mode = #tpu.pipeline_mode<synchronous>, transform_indices = @transform_3, window_bounds = array<i64: 16, 32>}, {pipeline_mode = #tpu.pipeline_mode<synchronous>, transform_indices = @transform_4, window_bounds = array<i64: 16, 1>}, {pipeline_mode = #tpu.pipeline_mode<synchronous>, transform_indices = @transform_5, window_bounds = array<i64: 1, 16>}, {pipeline_mode = #tpu.pipeline_mode<synchronous>, transform_indices = @transform_6, window_bounds = array<i64: 1, 1>}, {transform_indices = @transform_7, window_bounds = array<i64: 1, 256>}, {transform_indices = @transform_8, window_bounds = array<i64: 1, 256>}]} {
    %c0 = arith.constant 0 : index
    %c0_0 = arith.constant 0 : index
    %0 = vector.load %arg1[%c0, %c0_0] : memref<256x32xf32, #tpu.memory_space<vmem>>, vector<256x32xf32>
    %1 = tpu.transpose %0, [1, 0] : vector<256x32xf32> -> vector<32x256xf32>
    %2 = tpu.iota {dimensions = array<i32: 0>} : vector<32x256xi32>
    %c4_i32 = arith.constant 4 : i32
    %3 = vector.broadcast %c4_i32 : i32 to vector<32x256xi32>
    %4 = arith.cmpi sge, %2, %3 : vector<32x256xi32>
    %c6_i32 = arith.constant 6 : i32
    %5 = vector.broadcast %c6_i32 : i32 to vector<32x256xi32>
    %6 = arith.cmpi slt, %2, %5 : vector<32x256xi32>
    %7 = arith.andi %4, %6 : vector<32x256xi1>
    %cst = arith.constant 0xFF800000 : f32
    %8 = vector.broadcast %cst : f32 to vector<32x256xf32>
    %9 = arith.select %7, %1, %8 : vector<32x256xi1>, vector<32x256xf32>
    %cst_1 = arith.constant dense<0xFF800000> : vector<256xf32>
    %10 = vector.multi_reduction <maximumf>, %9, %cst_1 [0] : vector<32x256xf32> to vector<256xf32>
    %11 = vector.shape_cast %10 : vector<256xf32> to vector<1x256xf32>
    %12 = vector.broadcast %11 : vector<1x256xf32> to vector<32x256xf32>
    %13 = arith.cmpf oeq, %9, %12 : vector<32x256xf32>
    %14 = arith.andi %7, %13 : vector<32x256xi1>
    %c4_i32_2 = arith.constant 4 : i32
    %15 = vector.broadcast %c4_i32_2 : i32 to vector<32x256xi32>
    %16 = arith.subi %2, %15 : vector<32x256xi32>
    %c2147483647_i32 = arith.constant 2147483647 : i32
    %17 = vector.broadcast %c2147483647_i32 : i32 to vector<32x256xi32>
    %18 = arith.select %14, %16, %17 : vector<32x256xi1>, vector<32x256xi32>
    %cst_3 = arith.constant dense<2147483647> : vector<256xi32>
    %19 = vector.multi_reduction <minsi>, %18, %cst_3 [0] : vector<32x256xi32> to vector<256xi32>
    %20 = vector.shape_cast %19 : vector<256xi32> to vector<1x256xi32>
    %c0_4 = arith.constant 0 : index
    %c0_5 = arith.constant 0 : index
    %21 = vector.load %arg9[%c0_4, %c0_5] : memref<1x256xi32, #tpu.memory_space<vmem>>, vector<1x256xi32>
    tpu.vector_store %arg9[%c0_4, %c0_5], %20 {strides = array<i32>} : memref<1x256xi32, #tpu.memory_space<vmem>>, vector<1x256xi32>,
    %cst_6 = arith.constant 0.000000e+00 : f32
    %22 = vector.broadcast %cst_6 : f32 to vector<32x256xf32>
    %23 = arith.select %7, %22, %1 : vector<32x256xi1>, vector<32x256xf32>
    %c0_7 = arith.constant 0 : index
    %c0_8 = arith.constant 0 : index
    %24 = vector.load %arg2[%c0_7, %c0_8] : memref<32x32xf32, #tpu.memory_space<vmem>>, vector<32x32xf32>
    %c0_9 = arith.constant 0 : index
    %c0_10 = arith.constant 0 : index
    %25 = vector.load %arg3[%c0_9, %c0_10] : memref<32x1xf32, #tpu.memory_space<vmem>>, vector<32x1xf32>
    %cst_11 = arith.constant dense<0.000000e+00> : vector<32x256xf32>
    %26 = tpu.matmul %24, %23, %cst_11 {dimension_numbers = #tpu.dot_dimension_numbers<[1], [0], [0], [1], [0, 0, 1, 1], [], []>} : vector<32x32xf32>, vector<32x256xf32>, vector<32x256xf32> -> vector<32x256xf32>
    %27 = vector.broadcast %25 : vector<32x1xf32> to vector<32x256xf32>
    %28 = arith.addf %26, %27 : vector<32x256xf32>
    %cst_12 = arith.constant 0.000000e+00 : f32
    %29 = vector.broadcast %cst_12 : f32 to vector<32x256xf32>
    %30 = arith.cmpf ogt, %28, %29 : vector<32x256xf32>
    %cst_13 = arith.constant 2.000000e-01 : f32
    %31 = vector.broadcast %cst_13 : f32 to vector<32x256xf32>
    %32 = arith.mulf %31, %28 : vector<32x256xf32>
    %33 = arith.select %30, %28, %32 : vector<32x256xi1>, vector<32x256xf32>
    %c0_14 = arith.constant 0 : index
    %c0_15 = arith.constant 0 : index
    %34 = vector.load %arg4[%c0_14, %c0_15] : memref<16x32xf32, #tpu.memory_space<vmem>>, vector<16x32xf32>
    %c0_16 = arith.constant 0 : index
    %c0_17 = arith.constant 0 : index
    %35 = vector.load %arg5[%c0_16, %c0_17] : memref<16x1xf32, #tpu.memory_space<vmem>>, vector<16x1xf32>
    %cst_18 = arith.constant dense<0.000000e+00> : vector<16x256xf32>
    %36 = tpu.matmul %34, %33, %cst_18 {dimension_numbers = #tpu.dot_dimension_numbers<[1], [0], [0], [1], [0, 0, 1, 1], [], []>} : vector<16x32xf32>, vector<32x256xf32>, vector<16x256xf32> -> vector<16x256xf32>
    %37 = vector.broadcast %35 : vector<16x1xf32> to vector<16x256xf32>
    %38 = arith.addf %36, %37 : vector<16x256xf32>
    %cst_19 = arith.constant 0.000000e+00 : f32
    %39 = vector.broadcast %cst_19 : f32 to vector<16x256xf32>
    %40 = arith.cmpf ogt, %38, %39 : vector<16x256xf32>
    %cst_20 = arith.constant 2.000000e-01 : f32
    %41 = vector.broadcast %cst_20 : f32 to vector<16x256xf32>
    %42 = arith.mulf %41, %38 : vector<16x256xf32>
    %43 = arith.select %40, %38, %42 : vector<16x256xi1>, vector<16x256xf32>
    %c0_21 = arith.constant 0 : index
    %c0_22 = arith.constant 0 : index
    %44 = vector.load %arg6[%c0_21, %c0_22] : memref<1x16xf32, #tpu.memory_space<vmem>>, vector<1x16xf32>
    %c0_23 = arith.constant 0 : index
    %c0_24 = arith.constant 0 : index
    %45 = vector.load %arg7[%c0_23, %c0_24] : memref<1x1xf32, #tpu.memory_space<vmem>>, vector<1x1xf32>
    %cst_25 = arith.constant dense<0.000000e+00> : vector<1x256xf32>
    %46 = tpu.matmul %44, %43, %cst_25 {dimension_numbers = #tpu.dot_dimension_numbers<[1], [0], [0], [1], [0, 0, 1, 1], [], []>} : vector<1x16xf32>, vector<16x256xf32>, vector<1x256xf32> -> vector<1x256xf32>
    %47 = vector.broadcast %45 : vector<1x1xf32> to vector<1x256xf32>
    %48 = arith.addf %46, %47 : vector<1x256xf32>
    %49 = arith.negf %48 : vector<1x256xf32>
    %50 = math.exp %49 : vector<1x256xf32>
    %cst_26 = arith.constant 1.000000e+00 : f32
    %51 = vector.broadcast %cst_26 : f32 to vector<1x256xf32>
    %52 = arith.addf %51, %50 : vector<1x256xf32>
    %53 = arith.divf %51, %52 : vector<1x256xf32>
    %c0_27 = arith.constant 0 : index
    %c0_28 = arith.constant 0 : index
    %54 = vector.load %arg8[%c0_27, %c0_28] : memref<1x256xf32, #tpu.memory_space<vmem>>, vector<1x256xf32>
    tpu.vector_store %arg8[%c0_27, %c0_28], %53 {strides = array<i32>} : memref<1x256xf32, #tpu.memory_space<vmem>>, vector<1x256xf32>,
    return
  }
  func.func @transform_0(%arg0: i32) -> (i32, i32) {
    %c0_i32 = arith.constant 0 : i32
    %c0_i32_0 = arith.constant 0 : i32
    return %arg0, %c0_i32 : i32, i32
  }
  func.func @transform_1(%arg0: i32) -> (i32, i32) {
    %c0_i32 = arith.constant 0 : i32
    %c0_i32_0 = arith.constant 0 : i32
    %c0_i32_1 = arith.constant 0 : i32
    return %c0_i32, %c0_i32_0 : i32, i32
  }
  func.func @transform_2(%arg0: i32) -> (i32, i32) {
    %c0_i32 = arith.constant 0 : i32
    %c0_i32_0 = arith.constant 0 : i32
    %c0_i32_1 = arith.constant 0 : i32
    return %c0_i32, %c0_i32_0 : i32, i32
  }
  func.func @transform_3(%arg0: i32) -> (i32, i32) {
    %c0_i32 = arith.constant 0 : i32
    %c0_i32_0 = arith.constant 0 : i32
    %c0_i32_1 = arith.constant 0 : i32
    return %c0_i32, %c0_i32_0 : i32, i32
  }
  func.func @transform_4(%arg0: i32) -> (i32, i32) {
    %c0_i32 = arith.constant 0 : i32
    %c0_i32_0 = arith.constant 0 : i32
    %c0_i32_1 = arith.constant 0 : i32
    return %c0_i32, %c0_i32_0 : i32, i32
  }
  func.func @transform_5(%arg0: i32) -> (i32, i32) {
    %c0_i32 = arith.constant 0 : i32
    %c0_i32_0 = arith.constant 0 : i32
    %c0_i32_1 = arith.constant 0 : i32
    return %c0_i32, %c0_i32_0 : i32, i32
  }
  func.func @transform_6(%arg0: i32) -> (i32, i32) {
    %c0_i32 = arith.constant 0 : i32
    %c0_i32_0 = arith.constant 0 : i32
    %c0_i32_1 = arith.constant 0 : i32
    return %c0_i32, %c0_i32_0 : i32, i32
  }
  func.func @transform_7(%arg0: i32) -> (i32, i32) {
    %c0_i32 = arith.constant 0 : i32
    %c0_i32_0 = arith.constant 0 : i32
    return %c0_i32, %arg0 : i32, i32
  }
  func.func @transform_8(%arg0: i32) -> (i32, i32) {
    %c0_i32 = arith.constant 0 : i32
    %c0_i32_0 = arith.constant 0 : i32
    return %c0_i32, %arg0 : i32, i32
  }
}

</mosaic_0001>

<bundles_post_ra>
// kernel: tpu_custom_call.1
= control target key start
LH: loop header
LB: loop body
LE: loop exit
PB: predicated region body
PF: predicated region fallthrough
CT: control target
= control target key end

     0   :  { %s1443_s0 = inlined_call_operand.vmem [shape: f32[512,32], index: 0, kind: input, shape index: {}]   ;;  %s1444_s1 = inlined_call_operand.vmem [shape: f32[32,32], index: 1, kind: input, shape index: {}]   ;;  %s1445_s2 = inlined_call_operand.vmem [shape: f32[32,1], index: 2, kind: input, shape index: {}]   ;;  %s1446_s3 = inlined_call_operand.vmem [shape: f32[16,32], index: 3, kind: input, shape index: {}]   ;;  %s1447_s4 = inlined_call_operand.vmem [shape: f32[16,1], index: 4, kind: input, shape index: {}]   ;;  %s1448_s5 = inlined_call_operand.vmem [shape: f32[1,16], index: 5, kind: input, shape index: {}]   ;;  %s1449_s6 = inlined_call_operand.<no memory space> [shape: f32[1,1], index: 6, kind: input, shape index: {}]   ;;  %s1450_s7 = inlined_call_operand.hbm [shape: f32[1,512], index: 7, kind: output, shape index: {0}]   ;;  %s1451_s8 = inlined_call_operand.hbm [shape: s32[1,512], index: 8, kind: output, shape index: {1}]  }
   0x1   :  { %1453 = sst [smem:[#allocation9_spill]] %s1443_s0  ;;  %v14_v0 = vstv %s1449_s6 }
   0x2   :  { %1454 = sst [smem:[#allocation10_spill]] %s1444_s1  ;;  %15 = vst [vmem:[#allocation2] sm:$0x1] %v14_v0 }
   0x3   :  { %16 = vsyncpa [#allocation4], 0 }
   0x4   :  { %18 = vsyncpa [#allocation4 + $0x1], 0 }
   0x5   :  { %19 = vsyncpa [#allocation6], 0 }
   0x6   :  { %21 = vsyncpa [#allocation6 + $0x1], 0  ;;  %s1202_s29 = smov 0   ;;  %s1204_s30 = smov 0  }
   0x7   :  { %s1206_s9 = smov 0   ;;  %s1208_s10 = smov 0  }
   0x8 LB: > { %s1223_s6 = sadd.s32 4294967295, %s1151_s10   ;;  %s958_s11 = sadd.s32 4294967294, %s1151_s10   ;;  %s1151_s10 = sphi %s1208_s10, %s1469_s10   ;;  %s1147_s9 = sphi %s1206_s9, %s1468_s9   ;;  %s1143_s30 = sphi %s1204_s30, %s1467_s30   ;;  %s1139_s29 = sphi %s1202_s29, %s1466_s29  }
   0x9   : > { %s1227_s12 = sadd.s32 1, %s1151_s10   ;;  %s186_s13 = sadd.s32 1, %s1147_s9 }
   0xa   : > { %s183_s14 = ssub.s32 %s1151_s10, %s1227_s12  ;;  %p196_p0 = scmp.ne.s32.totalorder %s1147_s9, %s1143_s30 }
   0xb   : > { %p184_p1 = scmp.eq.s32.totalorder %s183_s14, 0  ;;  %p197_p2 = scmp.eq.s32.totalorder %s1223_s6, 1 }
   0xc   : > { %p202_p3 = scmp.ne.s32.totalorder %s1143_s30, %s1139_s29  ;;  %p203_p4 = scmp.eq.s32.totalorder %s958_s11, 1 }
   0xd   : > { %s1238_s15 = scalar_select %p184_p1, %s1147_s9, %s186_s13  }
   0xe   : > { %p1240_p5 = por %p197_p2, %p196_p0  ;;  %p1244_p6 = por %p203_p4, %p202_p3 }
   0xf   : > { %p961_p7 = scmp.ge.s32.totalorder %s1151_s10, 1  ;;  %p274_p8 = scmp.lt.s32.totalorder %s1151_s10, 3 }
  0x11   : > { %p275_p9 = pnand %p961_p7, %p274_p8 }
  0x12   : > { %s964_s18 = sshll.u32 (!%p275_p9), %s1223_s6, 5  ;;  %s1457_s0 = sld [smem:[#allocation9_spill]] (!%p275_p9) }
  0x13   : > { %278 = sbr.rel (%p275_p9) target bundleno = 704 (0x2c0), region = 48  ;;  %p314_p10 = scmp.lt.s32.totalorder (!%p275_p9), %s964_s18, 63 }
  0x14   : > { %s1460_s1 = sld [smem:[#allocation10_spill]] (!%p275_p9)  ;;  %s998_s27 = sshll.u32 (!%p275_p9), %s1223_s6, 1 }
  0x15   : > { %s861_s13 = scalar_lea.hbm (!%p275_p9), %s1451_s8, %s998_s27 }
  0x18   : > { %s1471_s18 = smov (!%p314_p10, %s964_s18), 63  ;;  %v417_v33 = vlaneseq  ;;  %v1153_v35 = vmov 0   ;;  %v541_v36 = vld [vmem:[%s1445_s2 + $0x18] sm:$0xff]  ;;  %v540_v40 = vld [vmem:[%s1445_s2 + $0x10] sm:$0xff]  ;;  %v539_v53 = vld [vmem:[%s1445_s2 + $0x8] sm:$0xff] }
  0x19   : > { %s965_s19 = sshll.u32 %s1471_s18, 3  ;;  %1047 = vset.pattern.permute.xlu2 %v1153_v35  ;;  %v538_v62 = vld [vmem:[%s1445_s2] sm:$0xff]  ;;  %s865_s18 = sshll.u32 %s861_s13, 4  ;;  %s866_s18 = int_to_ptr.hbm [resolvable:$true] %s865_s18 }
  0x1a   : > { %s1254_s22 = scalar_lea.vmem %s1457_s0, %s965_s19  ;;  %v418_v34 = vshrl.u32 %v417_v33, 7  ;;  %559 = vperm.xlu2 %1047, %v541_v36   ;;  %s1324_s19 = sand.u32 1, %s1143_s30  }
  0x1b   : > { %v337_v1 = vld [vmem:[%s1254_s22 + $0x80] sm:$0xff]  ;;  %v338_v3 = vld [vmem:[%s1254_s22 + $0x88] sm:$0xff]  ;;  %v339_v5 = vld [vmem:[%s1254_s22 + $0x90] sm:$0xff]  ;;  %s837_s20 = scalar_lea.sflag [#allocation6], %s1324_s19  ;;  %s1071_s21 = sshra.s32 %s866_s18, 4  ;;  %s1072_s21 = int_to_ptr.hbm [resolvable:$true] %s1071_s21 }
  0x1c   : > { %v321_v2 = vld [vmem:[%s1254_s22] sm:$0xff]  ;;  %385 = vxpose.xlu0.b32.start [1/16] (narrow) %v337_v1, 32  ;;  %v322_v4 = vld [vmem:[%s1254_s22 + $0x8] sm:$0xff]  ;;  %v323_v6 = vld [vmem:[%s1254_s22 + $0x10] sm:$0xff]  ;;  %vm422_vm0 = vcmp.ge.s32.totalorder %v418_v34, 4  ;;  %vm426_vm1 = vcmp.lt.s32.totalorder %v418_v34, 6  ;;  %p1078_p0 = scmp.lt.s32.totalorder %s1072_s21, %s1451_s8 }
  0x1d   : > { %353 = vxpose.xlu1.b32.start [1/16] (narrow) %v321_v2, 32  ;;  %v340_v7 = vld [vmem:[%s1254_s22 + $0x98] sm:$0xff]  ;;  %v341_v9 = vld [vmem:[%s1254_s22 + $0xa0] sm:$0xff]  ;;  %v342_v11 = vld [vmem:[%s1254_s22 + $0xa8] sm:$0xff]  ;;  %v972_v56 = vadd.s32 4294967292, %v418_v34  ;;  %s1073_s23 = scalar_lea.hbm %s1072_s21, 2 }
  0x1e   : > { %v324_v8 = vld [vmem:[%s1254_s22 + $0x18] sm:$0xff]  ;;  %v325_v10 = vld [vmem:[%s1254_s22 + $0x20] sm:$0xff]  ;;  %v326_v12 = vld [vmem:[%s1254_s22 + $0x28] sm:$0xff]  ;;  %p1074_p11 = scmp.ne.s32.totalorder %s1072_s21, %s1073_s23 }
  0x1f   : > { %v343_v13 = vld [vmem:[%s1254_s22 + $0xb0] sm:$0xff]  ;;  %v344_v15 = vld [vmem:[%s1254_s22 + $0xb8] sm:$0xff]  ;;  %v345_v17 = vld [vmem:[%s1254_s22 + $0xc0] sm:$0xff] }
  0x20   : > { %v327_v14 = vld [vmem:[%s1254_s22 + $0x30] sm:$0xff]  ;;  %v328_v16 = vld [vmem:[%s1254_s22 + $0x38] sm:$0xff]  ;;  %v329_v18 = vld [vmem:[%s1254_s22 + $0x40] sm:$0xff]  ;;  %p1075_p12 = pnand %p1074_p11, %p1240_p5 }
  0x21   : > { %v346_v19 = vld [vmem:[%s1254_s22 + $0xc8] sm:$0xff]  ;;  %v347_v21 = vld [vmem:[%s1254_s22 + $0xd0] sm:$0xff]  ;;  %v348_v23 = vld [vmem:[%s1254_s22 + $0xd8] sm:$0xff] }
  0x22   : > { %v330_v20 = vld [vmem:[%s1254_s22 + $0x48] sm:$0xff]  ;;  %v331_v22 = vld [vmem:[%s1254_s22 + $0x50] sm:$0xff]  ;;  %v332_v24 = vld [vmem:[%s1254_s22 + $0x58] sm:$0xff]  ;;  %554 = vperm.xlu2 %1047, %v540_v40   ;;  %p1076_p13 = pneg %p1075_p12 }
  0x23   : > { %v349_v25 = vld [vmem:[%s1254_s22 + $0xe0] sm:$0xff]  ;;  %v350_v27 = vld [vmem:[%s1254_s22 + $0xe8] sm:$0xff]  ;;  %v351_v29 = vld [vmem:[%s1254_s22 + $0xf0] sm:$0xff] }
  0x24   : > { %386 = vxpose.xlu0.b32.cont [2/16] (narrow) %v338_v3, 32  ;;  %v333_v26 = vld [vmem:[%s1254_s22 + $0x60] sm:$0xff]  ;;  %v334_v28 = vld [vmem:[%s1254_s22 + $0x68] sm:$0xff]  ;;  %v335_v30 = vld [vmem:[%s1254_s22 + $0x70] sm:$0xff] }
  0x25   : > { %354 = vxpose.xlu1.b32.cont [2/16] (narrow) %v322_v4, 32  ;;  %v352_v31 = vld [vmem:[%s1254_s22 + $0xf8] sm:$0xff]  ;;  %vm1293_vm2 = vmand %vm422_vm0, %vm426_vm1  ;;  %vm562_vm0 = vcmask 261120  }
  0x26   : > { %v336_v32 = vld [vmem:[%s1254_s22 + $0x78] sm:$0xff]  ;;  %vm976_vm14 = vmneg %vm1293_vm2  ;;  %s1452_s22 = sshll.u32 %s1324_s19, 1 }
  0x27   : > { %s1347_s25 = scalar_lea.vmem [#allocation5], %s1452_s22  ;;  %s1077_s22 = scalar_lea.hbm %s1451_s8, 4 }
  0x28   : > { %s863_s14 = sshll.u32 %s1347_s25, 4  ;;  %p1079_p1 = scmp.lt.s32.totalorder %s1077_s22, %s1073_s23  ;;  %s864_s14 = int_to_ptr.vmem [resolvable:$true] %s863_s14 }
  0x2a   : > { %549 = vperm.xlu2 %1047, %v539_v53   ;;  %p1080_p2 = por %p1079_p1, %p1078_p0 }
  0x2c   : > { %387 = vxpose.xlu0.b32.cont [3/16] (narrow) %v339_v5, 32  ;;  %p1081_p3 = pnand %p1080_p2, %p1076_p13 }
  0x2d   : > { %355 = vxpose.xlu1.b32.cont [3/16] (narrow) %v323_v6, 32 }
  0x32   : > { %544 = vperm.xlu2 %1047, %v538_v62   ;;  %v657_v62 = vld [vmem:[%s1446_s3] sm:$0xff] }
  0x34   : > { %388 = vxpose.xlu0.b32.cont [4/16] (narrow) %v340_v7, 32 }
  0x35   : > { %356 = vxpose.xlu1.b32.cont [4/16] (narrow) %v324_v8, 32 }
  0x3c   : > { %389 = vxpose.xlu0.b32.cont [5/16] (narrow) %v341_v9, 32  ;;  %v660_v9 = vld [vmem:[%s1447_s4 + $0x8] sm:$0xff] }
  0x3d   : > { %357 = vxpose.xlu1.b32.cont [5/16] (narrow) %v325_v10, 32  ;;  %668 = vperm.xlu2 %1047, %v660_v9  }
  0x44   : > { %390 = vxpose.xlu0.b32.cont [6/16] (narrow) %v342_v11, 32 }
  0x45   : > { %358 = vxpose.xlu1.b32.cont [6/16] (narrow) %v326_v12, 32 }
  0x4c   : > { %391 = vxpose.xlu0.b32.cont [7/16] (narrow) %v343_v13, 32 }
  0x4d   : > { %359 = vxpose.xlu1.b32.cont [7/16] (narrow) %v327_v14, 32  ;;  %v534_v14 = vld [vmem:[%s1460_s1] sm:$0xff] }
  0x54   : > { %392 = vxpose.xlu0.b32.cont [8/16] (narrow) %v344_v15, 32 }
  0x55   : > { %360 = vxpose.xlu1.b32.cont [8/16] (narrow) %v328_v16, 32 }
  0x5c   : > { %393 = vxpose.xlu0.b32.cont [9/16] (narrow) %v345_v17, 32 }
  0x5d   : > { %361 = vxpose.xlu1.b32.cont [9/16] (narrow) %v329_v18, 32  ;;  %v659_v18 = vld [vmem:[%s1447_s4] sm:$0xff] }
  0x5e   : > { %663 = vperm.xlu2 %1047, %v659_v18   ;;  %v735_v18 = vld [vmem:[%s1448_s5] sm:$0x1] }
  0x64   : > { %394 = vxpose.xlu0.b32.cont [10/16] (narrow) %v346_v19, 32 }
  0x65   : > { %362 = vxpose.xlu1.b32.cont [10/16] (narrow) %v330_v20, 32 }
  0x6c   : > { %395 = vxpose.xlu0.b32.cont [11/16] (narrow) %v347_v21, 32 }
  0x6d   : > { %363 = vxpose.xlu1.b32.cont [11/16] (narrow) %v331_v22, 32 }
  0x74   : > { %396 = vxpose.xlu0.b32.cont [12/16] (narrow) %v348_v23, 32 }
  0x75   : > { %364 = vxpose.xlu1.b32.cont [12/16] (narrow) %v332_v24, 32  ;;  %v535_v24 = vld [vmem:[%s1460_s1 + $0x8] sm:$0xff] }
  0x7c   : > { %397 = vxpose.xlu0.b32.cont [13/16] (narrow) %v349_v25, 32  ;;  %v736_v25 = vld [vmem:[#allocation2] sm:$0x1] }
  0x7d   : > { %365 = vxpose.xlu1.b32.cont [13/16] (narrow) %v333_v26, 32  ;;  %739 = vperm.xlu2 %1047, %v736_v25   ;;  %v536_v26 = vld [vmem:[%s1460_s1 + $0x10] sm:$0xff] }
  0x84   : > { %398 = vxpose.xlu0.b32.cont [14/16] (narrow) %v350_v27, 32  ;;  %v537_v27 = vld [vmem:[%s1460_s1 + $0x18] sm:$0xff] }
  0x85   : > { %366 = vxpose.xlu1.b32.cont [14/16] (narrow) %v334_v28, 32  ;;  %v560_v28 = vpop.permute.xlu2 %559 }
  0x8c   : > { %399 = vxpose.xlu0.b32.cont [15/16] (narrow) %v351_v29, 32 }
  0x8d   : > { %367 = vxpose.xlu1.b32.cont [15/16] (narrow) %v335_v30, 32 }
  0x94   : > { %400 = vxpose.xlu0.b32.end [16/16] (narrow) %v352_v31, 32  ;;  %v555_v31 = vpop.permute.xlu2 %554 }
  0x95   : > { %368 = vxpose.xlu1.b32.end [16/16] (narrow) %v336_v32, 32 }
  0x9c   : > { %v550_v34 = vpop.permute.xlu2 %549 }
  0xc0   : > { %v1297_v38 = vpop.trf.xlu0 }
  0xc1   : > { %v1299_v39 = vpop.trf.xlu1  ;;  %v435_v41 = vsel %vm1293_vm2, %v1297_v38, -inf }
  0xc2   : > { %v434_v42 = vsel %vm1293_vm2, %v1299_v39, -inf  ;;  %v454_v43 = vrot.slane %v435_v41, 4 }
  0xc3   : > { %v445_v44 = vrot.slane %v434_v42, 4 }
  0xc4   : > { %v455_v45 = vmax.f32 %v435_v41, %v454_v43 }
  0xc5   : > { %v446_v46 = vmax.f32 %v434_v42, %v445_v44 }
  0xc6   : > { %v456_v47 = vrot.slane %v455_v45, 2 }
  0xc7   : > { %v447_v48 = vrot.slane %v446_v46, 2 }
  0xc8   : > { %v457_v49 = vmax.f32 %v455_v45, %v456_v47  ;;  %v402_v51 = vpop.trf.xlu0 }
  0xc9   : > { %v448_v50 = vmax.f32 %v446_v46, %v447_v48  ;;  %v370_v52 = vpop.trf.xlu1 }
  0xca   : > { %v458_v54 = vrot.slane %v457_v49, 1 }
  0xcb   : > { %v449_v55 = vrot.slane %v448_v50, 1 }
  0xcc   : > { %v459_v57 = vmax.f32 %v457_v49, %v458_v54 }
  0xcd   : > { %v450_v58 = vmax.f32 %v448_v50, %v449_v55 }
  0xce   : > { %vm461_vm3 = vcmp.eq.f32.partialorder %v435_v41, %v459_v57 }
  0xcf   : > { %vm460_vm4 = vcmp.eq.f32.partialorder %v434_v42, %v450_v58  ;;  %vm469_vm5 = vmand %vm1293_vm2, %vm461_vm3  ;;  %v545_v42 = vpop.permute.xlu2 %544 }
  0xd0   : > { %v481_v59 = vsel %vm469_vm5, %v972_v56, 2147483647  ;;  %vm468_vm6 = vmand %vm1293_vm2, %vm460_vm4  ;;  %v403_v60 = vpop.trf.xlu0  ;;  %vm519_vm2 = vcmask 1040384   ;;  %vm1340_vm4 = vcmp.lt.s32.totalorder %v417_v33, 256 }
  0xd1   : > { %v371_v61 = vpop.trf.xlu1  ;;  %vm503_vm7 = vcmp.lt.s32.totalorder %v481_v59, 2147483647  ;;  %v480_v63 = vsel %vm468_vm6, %v972_v56, 2147483647 }
  0xd2   : > { %v504_v0 = vsel %vm503_vm7, %v481_v59, 2147483647  ;;  %vm488_vm8 = vcmp.lt.s32.totalorder %v480_v63, 2147483647 }
  0xd3   : > { %vm507_vm9 = vcmp.lt.s32.totalorder %v504_v0, 2147483647  ;;  %v489_v1 = vsel %vm488_vm8, %v480_v63, 2147483647 }
  0xd4   : > { %v508_v2 = vsel %vm507_vm9, %v504_v0, 2147483647  ;;  %vm492_vm10 = vcmp.lt.s32.totalorder %v489_v1, 2147483647 }
  0xd5   : > { %v509_v3 = vrot.slane %v508_v2, 4  ;;  %v493_v4 = vsel %vm492_vm10, %v489_v1, 2147483647  ;;  %v658_v1 = vld [vmem:[%s1446_s3 + $0x8] sm:$0xff] }
  0xd6   : > { %v494_v5 = vrot.slane %v493_v4, 4 }
  0xd7   : > { %vm510_vm11 = vcmp.lt.s32.totalorder %v508_v2, %v509_v3 }
  0xd8   : > { %v511_v6 = vsel %vm510_vm11, %v508_v2, %v509_v3  ;;  %vm495_vm12 = vcmp.lt.s32.totalorder %v493_v4, %v494_v5  ;;  %v404_v7 = vpop.trf.xlu0  ;;  %v669_v2 = vpop.permute.xlu2 %668 }
  0xd9   : > { %v372_v8 = vpop.trf.xlu1  ;;  %v512_v10 = vrot.slane %v511_v6, 2  ;;  %v496_v11 = vsel %vm495_vm12, %v493_v4, %v494_v5  ;;  %616 = vmatpush.msra.mxu1 %v404_v7 }
  0xda   : > { %587 = vmatpush.msra.mxu0 %v372_v8  ;;  %v497_v12 = vrot.slane %v496_v11, 2 }
  0xdb   : > { %vm513_vm13 = vcmp.lt.s32.totalorder %v511_v6, %v512_v10  ;;  %617 = vmatpush.msra.mxu1 %v403_v60 }
  0xdc   : > { %588 = vmatpush.msra.mxu0 %v371_v61  ;;  %v514_v13 = vsel %vm513_vm13, %v511_v6, %v512_v10  ;;  %vm498_vm15 = vcmp.lt.s32.totalorder %v496_v11, %v497_v12 }
  0xdd   : > { %618 = vmatpush.msra.mxu1 %v402_v51  ;;  %v499_v15 = vsel %vm498_vm15, %v496_v11, %v497_v12  ;;  %v515_v16 = vrot.slane %v514_v13, 1 }
  0xde   : > { %589 = vmatpush.msra.mxu0 %v370_v52  ;;  %v500_v17 = vrot.slane %v499_v15, 1 }
  0xdf   : > { %983 = vmatpush.msk.msra.mxu1 %vm976_vm14, %v1297_v38  ;;  %vm516_vm1 = vcmp.lt.s32.totalorder %v514_v13, %v515_v16 }
  0xe0   : > { %977 = vmatpush.msk.msra.mxu0 %vm976_vm14, %v1299_v39  ;;  %984 = vmatmul.msk.f32.vlgmr.msra.gmra.mxu1 %vm562_vm0, %v534_v14  ;;  %vm501_vm3 = vcmp.lt.s32.totalorder %v499_v15, %v500_v17  ;;  %v517_v19 = vsel %vm516_vm1, %v514_v13, %v515_v16  ;;  %v664_v5 = vpop.permute.xlu2 %663  ;;  %vm743_vm1 = vcmask 130048  }
  0xe1   : > { %978 = vmatmul.msk.f32.vlgmr.msra.gmra.mxu0 %vm562_vm0, %v534_v14  ;;  %v518_v21 = vrot.slane %v517_v19, 7  ;;  %v502_v22 = vsel %vm501_vm3, %v499_v15, %v500_v17 }
  0xe3   : > { %v520_v23 = vsel %vm519_vm2, %v502_v22, %v518_v21 }
  0xe4   : > { %525 = vst.msk [vmem:[%s1347_s25] sm:$0x3] %vm1340_vm4, %v520_v23 }
  0xe8   : > { %985 = vmatmul.msk.f32.gmra.mxu1 %vm562_vm0, %v535_v24 }
  0xe9   : > { %979 = vmatmul.msk.f32.gmra.mxu0 %vm562_vm0, %v535_v24 }
  0xf0   : > { %986 = vmatmul.msk.f32.gmra.mxu1 %vm562_vm0, %v536_v26 }
  0xf1   : > { %980 = vmatmul.msk.f32.gmra.mxu0 %vm562_vm0, %v536_v26 }
  0xf8   : > { %987 = vmatmul.msk.f32.gmra.mxu1 %vm562_vm0, %v537_v27 }
  0xf9   : > { %981 = vmatmul.msk.f32.gmra.mxu0 %vm562_vm0, %v537_v27 }
  0xfb   : > { %1048 = vset.pattern.permute.xlu0 %v1153_v35 }
 0x15d   : > { %v621_v30 = vpop.f32.mrf.mxu1 }
 0x15e   : > { %v592_v29 = vpop.f32.mrf.mxu0  ;;  %v622_v35 = vadd.f32 %v621_v30, %v545_v42 }
 0x15f   : > { %v593_v47 = vadd.f32 %v592_v29, %v545_v42 }
 0x160   : > { %v642_v59 = vmul.f32 0.2, %v622_v35  ;;  %vm634_vm12 = vcmp.gt.f32.partialorder %v622_v35, 0.0 }
 0x161   : > { %v641_v58 = vmul.f32 0.2, %v593_v47  ;;  %vm633_vm11 = vcmp.gt.f32.partialorder %v593_v47, 0.0 }
 0x162   : > { %v650_v0 = vsel %vm634_vm12, %v622_v35, %v642_v59 }
 0x163   : > { %v649_v63 = vsel %vm633_vm11, %v593_v47, %v641_v58 }
 0x165   : > { %v624_v33 = vpop.f32.mrf.mxu1 }
 0x166   : > { %v595_v32 = vpop.f32.mrf.mxu0  ;;  %v625_v44 = vadd.f32 %v624_v33, %v550_v34 }
 0x167   : > { %v596_v43 = vadd.f32 %v595_v32, %v550_v34 }
 0x168   : > { %v644_v55 = vmul.f32 0.2, %v625_v44  ;;  %vm636_vm10 = vcmp.gt.f32.partialorder %v625_v44, 0.0 }
 0x169   : > { %v643_v54 = vmul.f32 0.2, %v596_v43  ;;  %vm635_vm9 = vcmp.gt.f32.partialorder %v596_v43, 0.0 }
 0x16a   : > { %v652_v61 = vsel %vm636_vm10, %v625_v44, %v644_v55 }
 0x16b   : > { %v651_v60 = vsel %vm635_vm9, %v596_v43, %v643_v54 }
 0x16d   : > { %v627_v37 = vpop.f32.mrf.mxu1 }
 0x16e   : > { %v598_v36 = vpop.f32.mrf.mxu0  ;;  %v628_v39 = vadd.f32 %v627_v37, %v555_v31 }
 0x16f   : > { %v599_v38 = vadd.f32 %v598_v36, %v555_v31 }
 0x170   : > { %v646_v49 = vmul.f32 0.2, %v628_v39  ;;  %vm638_vm8 = vcmp.gt.f32.partialorder %v628_v39, 0.0 }
 0x171   : > { %v645_v48 = vmul.f32 0.2, %v599_v38  ;;  %vm637_vm7 = vcmp.gt.f32.partialorder %v599_v38, 0.0 }
 0x172   : > { %v654_v57 = vsel %vm638_vm8, %v628_v39, %v646_v49 }
 0x173   : > { %v653_v56 = vsel %vm637_vm7, %v599_v38, %v645_v48 }
 0x175   : > { %v630_v41 = vpop.f32.mrf.mxu1 }
 0x176   : > { %v601_v40 = vpop.f32.mrf.mxu0  ;;  %v631_v46 = vadd.f32 %v630_v41, %v560_v28 }
 0x177   : > { %v602_v45 = vadd.f32 %v601_v40, %v560_v28 }
 0x178   : > { %vm640_vm6 = vcmp.gt.f32.partialorder %v631_v46, 0.0  ;;  %v648_v51 = vmul.f32 0.2, %v631_v46 }
 0x179   : > { %vm639_vm5 = vcmp.gt.f32.partialorder %v602_v45, 0.0  ;;  %v647_v50 = vmul.f32 0.2, %v602_v45 }
 0x17a   : > { %v656_v53 = vsel %vm640_vm6, %v631_v46, %v648_v51 }
 0x17b   : > { %v655_v52 = vsel %vm639_vm5, %v602_v45, %v647_v50  ;;  %712 = vmatpush.msra.mxu3 %v656_v53 }
 0x17c   : > { %689 = vmatpush.msra.mxu2 %v655_v52 }
 0x17d   : > { %713 = vmatpush.msra.mxu3 %v654_v57 }
 0x17e   : > { %690 = vmatpush.msra.mxu2 %v653_v56 }
 0x17f   : > { %714 = vmatpush.msra.mxu3 %v652_v61 }
 0x180   : > { %691 = vmatpush.msra.mxu2 %v651_v60 }
 0x181   : > { %715 = vmatpush.msra.mxu3 %v650_v0 }
 0x182   : > { %692 = vmatpush.msra.mxu2 %v649_v63  ;;  %990 = vmatmul.msk.f32.vlgmr.msra.gmra.mxu3 %vm562_vm0, %v657_v62 }
 0x183   : > { %988 = vmatmul.msk.f32.vlgmr.msra.gmra.mxu2 %vm562_vm0, %v657_v62 }
 0x18a   : > { %991 = vmatmul.msk.f32.gmra.mxu3 %vm562_vm0, %v658_v1 }
 0x18b   : > { %989 = vmatmul.msk.f32.gmra.mxu2 %vm562_vm0, %v658_v1 }
 0x205   : > { %v717_v4 = vpop.f32.mrf.mxu3 }
 0x206   : > { %v694_v3 = vpop.f32.mrf.mxu2  ;;  %v718_v7 = vadd.f32 %v717_v4, %v664_v5 }
 0x207   : > { %v695_v6 = vadd.f32 %v694_v3, %v664_v5 }
 0x208   : > { %v728_v13 = vmul.f32 0.2, %v718_v7  ;;  %vm724_vm0 = vcmp.gt.f32.partialorder %v718_v7, 0.0 }
 0x209   : > { %v727_v12 = vmul.f32 0.2, %v695_v6  ;;  %vm723_vm15 = vcmp.gt.f32.partialorder %v695_v6, 0.0 }
 0x20a   : > { %v732_v21 = vsel %vm724_vm0, %v718_v7, %v728_v13 }
 0x20b   : > { %v731_v19 = vsel %vm723_vm15, %v695_v6, %v727_v12 }
 0x20d   : > { %v720_v9 = vpop.f32.mrf.mxu3 }
 0x20e   : > { %v697_v8 = vpop.f32.mrf.mxu2  ;;  %v721_v11 = vadd.f32 %v720_v9, %v669_v2 }
 0x20f   : > { %v698_v10 = vadd.f32 %v697_v8, %v669_v2 }
 0x210   : > { %vm726_vm14 = vcmp.gt.f32.partialorder %v721_v11, 0.0  ;;  %v730_v15 = vmul.f32 0.2, %v721_v11 }
 0x211   : > { %vm725_vm13 = vcmp.gt.f32.partialorder %v698_v10, 0.0  ;;  %v729_v14 = vmul.f32 0.2, %v698_v10 }
 0x212   : > { %v734_v17 = vsel %vm726_vm14, %v721_v11, %v730_v15 }
 0x213   : > { %v733_v16 = vsel %vm725_vm13, %v698_v10, %v729_v14  ;;  %781 = vmatpush.msrb.mxu3 %v734_v17 }
 0x214   : > { %761 = vmatpush.msrb.mxu2 %v733_v16 }
 0x215   : > { %782 = vmatpush.msrb.mxu3 %v732_v21 }
 0x216   : > { %762 = vmatpush.msrb.mxu2 %v731_v19  ;;  %993 = vmatmul.msk.f32.vlgmr.msrb.gmra.mxu3 %vm743_vm1, %v735_v18 }
 0x217   : > { %992 = vmatmul.msk.f32.vlgmr.msrb.gmra.mxu2 %vm743_vm1, %v735_v18 }
 0x218   : > { %1084 = shalt.err (!%p1081_p3)
}
 0x219   : > { %1003 = dma.vmem_to_hbm [thread:$0]  (%p1240_p5), %s864_s14, 32, %s866_s18, %s837_s20   ;;  %v740_v22 = vpop.permute.xlu2 %739 }
 0x21a   : > { %v742_v23 = vperm.slane %v740_v22, 0  ;;  %s847_s22 = scalar_lea.hbm %s1450_s7, %s998_s27  ;;  %s1465_s6 = sshll.u32 %s1324_s19, 1 }
 0x21b   : > { %s305_s25 = scalar_lea.vmem [#allocation3], %s1465_s6  ;;  %s851_s27 = sshll.u32 %s847_s22, 4  ;;  %s852_s27 = int_to_ptr.hbm [resolvable:$true] %s851_s27 }
 0x21c   : > { %s849_s28 = sshll.u32 %s305_s25, 4  ;;  %s832_s11 = scalar_lea.sflag [#allocation4], %s1324_s19  ;;  %s850_s28 = int_to_ptr.vmem [resolvable:$true] %s849_s28 }
 0x21d   : > { %s1099_s13 = sshra.s32 %s852_s27, 4  ;;  %s1105_s21 = scalar_lea.hbm %s1450_s7, 4  ;;  %s1100_s13 = int_to_ptr.hbm [resolvable:$true] %s1099_s13 }
 0x21e   : > { %s1101_s14 = scalar_lea.hbm %s1100_s13, 2  ;;  %p1106_p9 = scmp.lt.s32.totalorder %s1100_s13, %s1450_s7 }
 0x21f   : > { %p1102_p4 = scmp.ne.s32.totalorder %s1100_s13, %s1101_s14  ;;  %p1107_p10 = scmp.lt.s32.totalorder %s1105_s21, %s1101_s14 }
 0x221   : > { %p1103_p7 = pnand %p1102_p4, %p1240_p5  ;;  %p1108_p11 = por %p1107_p10, %p1106_p9 }
 0x223   : > { %p1104_p8 = pneg %p1103_p7 }
 0x225   : > { %p1109_p12 = pnand %p1108_p11, %p1104_p8 }
 0x299   : > { %v784_v25 = vpop.f32.mrf.mxu3 }
 0x29a   : > { %v764_v24 = vpop.f32.mrf.mxu2  ;;  %v785_v27 = vadd.f32 %v784_v25, %v742_v23 }
 0x29b   : > { %v765_v26 = vadd.f32 %v764_v24, %v742_v23 }
 0x29c   : > { %v995_v29 = vmul.f32 -1.442695, %v785_v27 }
 0x29d   : > { %v994_v28 = vmul.f32 -1.442695, %v765_v26 }
 0x29f   : > { %1049 = vpow2.f32 %v994_v28 }
 0x2a0   : > { %1051 = vpow2.f32 %v995_v29 }
 0x2a5   : > { %v1050_v30 = vpop.eup %1049 }
 0x2a6   : > { %v1052_v31 = vpop.eup %1051  ;;  %v793_v32 = vadd.f32 1.0, %v1050_v30 }
 0x2a7   : > { %v794_v33 = vadd.f32 1.0, %v1052_v31 }
 0x2a8   : > { %1053 = vrcp.f32 %v793_v32  ;;  %vm800_vm6 = vweird.f32 %v793_v32  ;;  %v806_v46 = vand.u32 2147483648, %v793_v32  ;;  %v804_v35 = vand.u32 2147483647, %v793_v32 }
 0x2a9   : > { %1055 = vrcp.f32 %v794_v33  ;;  %v821_v42 = vand.u32 2147483648, %v794_v33  ;;  %v819_v44 = vand.u32 2147483647, %v794_v33  ;;  %vm815_vm7 = vweird.f32 %v794_v33 }
 0x2aa   : > { %v807_v52 = vor.u32 1.1754944e-38, %v806_v46  ;;  %vm805_vm11 = vcmp.eq.f32.partialorder %v804_v35, 8.507059e+37 }
 0x2ab   : > { %v822_v49 = vor.u32 1.1754944e-38, %v821_v42  ;;  %vm820_vm10 = vcmp.eq.f32.partialorder %v819_v44, 8.507059e+37 }
 0x2ae   : > { %v1054_v34 = vpop.eup %1053 }
 0x2af   : > { %v1056_v36 = vpop.eup %1055  ;;  %v796_v37 = vmul.f32 %v1054_v34, %v793_v32  ;;  %vm801_vm3 = vweird.f32 %v1054_v34 }
 0x2b0   : > { %v811_v38 = vmul.f32 %v1056_v36, %v794_v33  ;;  %vm816_vm5 = vweird.f32 %v1056_v36  ;;  %vm1404_vm8 = vmor %vm800_vm6, %vm801_vm3 }
 0x2b1   : > { %v797_v39 = vsub.f32 1.0, %v796_v37  ;;  %vm817_vm9 = vmor %vm815_vm7, %vm816_vm5 }
 0x2b2   : > { %v812_v40 = vsub.f32 1.0, %v811_v38 }
 0x2b3   : > { %v798_v41 = vmul.f32 %v1054_v34, %v797_v39 }
 0x2b4   : > { %v813_v43 = vmul.f32 %v1056_v36, %v812_v40 }
 0x2b5   : > { %v799_v45 = vadd.f32 %v1054_v34, %v798_v41 }
 0x2b6   : > { %v814_v48 = vadd.f32 %v1056_v36, %v813_v43 }
 0x2b7   : > { %v803_v50 = vsel %vm1404_vm8, %v1054_v34, %v799_v45 }
 0x2b8   : > { %v818_v51 = vsel %vm817_vm9, %v1056_v36, %v814_v48  ;;  %v808_v55 = vsel %vm805_vm11, %v807_v52, %v803_v50 }
 0x2b9   : > { %v823_v53 = vsel %vm820_vm10, %v822_v49, %v818_v51 }
 0x2ba   : > { %v827_v54 = vrot.slane %v823_v53, 7 }
 0x2bc   : > { %v828_v56 = vsel %vm519_vm2, %v808_v55, %v827_v54 }
 0x2bd   : > { %830 = vst.msk [vmem:[%s305_s25] sm:$0x3] %vm1340_vm4, %v828_v56 }
 0x2be   : > { %1112 = shalt.err (!%p1109_p12)
}
 0x2bf   : > { %1002 = dma.vmem_to_hbm [thread:$0]  (%p1240_p5), %s850_s28, 32, %s852_s27, %s832_s11  }
 0x2c0 PF: > { %p1013_p13 = scmp.ge.s32.totalorder %s1151_s10, 2  ;;  %s877_s19 = sand.u32 1, %s1139_s29  }
 0x2c1   : > { %s878_s26 = scalar_lea.sflag [#allocation4], %s877_s19 }
 0x2c2   : > { %p1007_p0 = pnand %p1013_p13, %p1244_p6 }
 0x2c4   : > { %p1008_p1 = pneg %p1007_p0 }
 0x2c6   : > { %1130 = dma.done.wait (%p1008_p1), %s878_s26, 32  }
 0x2c7   : > { %1132 = vsyncadd (%p1008_p1), %s878_s26, 4294967264  ;;  %s888_s0 = scalar_lea.sflag [#allocation6], %s877_s19 }
 0x2c8   : > { %1134 = dma.done.wait (%p1008_p1), %s888_s0, 32  }
 0x2c9   : > { %1136 = vsyncadd (%p1008_p1), %s888_s0, 4294967264  ;;  %p24_p5 = scmp.ge.s32.totalorder %s1227_s12, 4   ;;  %s1466_s29 = smov %s1143_s30 }
 0x2ca   : > { %s1467_s30 = smov %s1147_s9  ;;  %s1468_s9 = smov %s1238_s15 }
 0x2cb   : > { %s1469_s10 = smov %s1227_s12  ;;  %26 = sbr.rel (!%p24_p5) target bundleno = 8 (0x8), region = 100 }
 0x2d0   :  { %894 = vsyncpa [#allocation4], 1 }
 0x2d1   :  { %896 = vsyncpa [#allocation4 + $0x1], 1 }
 0x2d2   :  { %897 = vsyncpa [#allocation6], 1 }
 0x2d3   :  { %899 = vsyncpa [#allocation6 + $0x1], 1 }

</bundles_post_ra>
